<compile_context>
chip_gen: v7x
topology: tpu7x:2x2x1
jax: 0.10.0
libtpu: 0.0.40
codegen_flags: <defaults>
</compile_context>

<pallas_src>
import functools

import numpy as np
import jax
import jax.numpy as jnp
from jax import lax
from jax.experimental import pallas as pl
from jax.experimental.pallas import tpu as pltpu


def _conv_classifier_kernel(K, W, x_ref, mask_ref, w2_ref, bc_ref, wl_ref, bl_ref, o_ref):
    """Fused per-sample Conv2d('same') + Flatten + Linear.

    x_ref   : (1, C_in, HW)       f32, spatial flattened (lane axis = HW)
    mask_ref: (K*K, HW)           f32, per-tap 'same'-padding destination masks
    w2_ref  : (C_out, K*K*C_in)   bf16, im2col conv weight
    bc_ref  : (C_out, 1)          f32, conv bias
    wl_ref  : (HW, NC_pad)        bf16, linear weight (transposed, lane-padded)
    bl_ref  : (1, NC_pad)         f32, linear bias (lane-padded)
    o_ref   : (1, C_out, NC_pad)
    """
    HW = x_ref.shape[-1]
    p = (K - 1) // 2
    x = x_ref[0]                                    # (C_in, HW) f32

    # im2col: one rolled + masked copy of x per conv tap (kh, kw).
    pieces = []
    for kh in range(K):                             # K*K statically unrolled taps
        for kw in range(K):
            dh = kh - p
            dw = kw - p
            delta = dh * W + dw                     # flat source offset
            if delta == 0:
                shifted = x
            else:
                # shifted[ci, i] = x[ci, (i + delta) mod HW]; any wrapped /
                # out-of-image read is zeroed by the destination-only mask.
                shifted = pltpu.roll(x, shift=(-delta) % HW, axis=1)
            if dh == 0 and dw == 0:
                pieces.append(shifted)              # center tap: mask is all-ones
            else:
                m = mask_ref[pl.ds(kh * K + kw, 1), :]       # (1, HW)
                pieces.append(shifted * m)
    cols = jnp.concatenate(pieces, axis=0)          # (K*K*C_in, HW) f32

    # Conv as a single MXU matmul (bf16 operands, f32 accumulation) + bias.
    conv = jnp.dot(w2_ref[...], cols.astype(jnp.bfloat16),
                   preferred_element_type=jnp.float32)       # (C_out, HW)
    conv = conv + bc_ref[...]

    # Linear head over the flattened spatial dim; NC_pad lanes -> unmasked store.
    out = jnp.dot(conv.astype(jnp.bfloat16), wl_ref[...],
                  preferred_element_type=jnp.float32) + bl_ref[...]
    o_ref[0] = out.astype(o_ref.dtype)


@jax.jit
def conv_classifier_forward(x, conv_w, conv_b, lin_w, lin_b):
    """PyTorch-equivalent forward: Linear(Flatten(Conv2d_same(x))) -> (B, C_out, NC)."""
    B, C_in, H, W = x.shape
    C_out, C_in_w, K, K2 = conv_w.shape
    assert C_in_w == C_in and K == K2
    assert K % 2 == 1, "padding='same' implemented for odd kernel_size"
    # TODO(synk): even kernel_size needs PyTorch's asymmetric 'same' padding.
    NC, F = lin_w.shape
    HW = H * W
    assert F == HW
    KK = K * K
    NC_pad = ((NC + 127) // 128) * 128              # lane-dense head / output store
    p = (K - 1) // 2

    # ---- Layout plumbing only (dtype casts / transposes / zero padding) ----
    x_flat = x.reshape(B, C_in, HW)
    # im2col conv weight: W2[co, (kh*K+kw)*C_in + ci] = conv_w[co, ci, kh, kw]
    w2 = jnp.transpose(conv_w, (0, 2, 3, 1)).reshape(C_out, KK * C_in).astype(jnp.bfloat16)
    bc = conv_b.reshape(C_out, 1).astype(jnp.float32)
    wl = jnp.pad(lin_w.T.astype(jnp.bfloat16), ((0, 0), (0, NC_pad - NC)))
    bl = jnp.pad(lin_b.reshape(1, NC).astype(jnp.float32), ((0, 0), (0, NC_pad - NC)))

    # Per-tap 'same'-padding masks over destination flat index i = h*W + w
    # (depend only on static shapes -> baked in as a tiny constant table).
    hw_idx = np.arange(HW)
    h_i, w_i = hw_idx // W, hw_idx % W
    masks_np = np.zeros((KK, HW), np.float32)
    for kh in range(K):
        for kw in range(K):
            dh, dw = kh - p, kw - p
            masks_np[kh * K + kw] = ((h_i + dh >= 0) & (h_i + dh < H) &
                                     (w_i + dw >= 0) & (w_i + dw < W))
    masks = jnp.asarray(masks_np)

    kernel = functools.partial(_conv_classifier_kernel, K, W)

    flops = 2 * B * (C_out * KK * C_in * HW + C_out * HW * NC_pad)
    bytes_accessed = (x_flat.size * x_flat.dtype.itemsize
                      + masks.size * 4 + w2.size * 2 + bc.size * 4
                      + wl.size * 2 + bl.size * 4
                      + B * C_out * NC_pad * x.dtype.itemsize)

    out_padded = pl.pallas_call(
        kernel,
        out_shape=jax.ShapeDtypeStruct((B, C_out, NC_pad), x.dtype),
        grid_spec=pltpu.PrefetchScalarGridSpec(
            num_scalar_prefetch=0,
            grid=(B,),
            in_specs=[
                pl.BlockSpec((1, C_in, HW), lambda b: (b, 0, 0)),      # per-sample
                pl.BlockSpec((KK, HW), lambda b: (0, 0)),              # resident
                pl.BlockSpec((C_out, KK * C_in), lambda b: (0, 0)),    # resident
                pl.BlockSpec((C_out, 1), lambda b: (0, 0)),            # resident
                pl.BlockSpec((HW, NC_pad), lambda b: (0, 0)),          # resident
                pl.BlockSpec((1, NC_pad), lambda b: (0, 0)),           # resident
            ],
            out_specs=pl.BlockSpec((1, C_out, NC_pad), lambda b: (b, 0, 0)),
        ),
        compiler_params=pltpu.CompilerParams(
            dimension_semantics=("parallel",)),
        cost_estimate=pl.CostEstimate(
            flops=flops, transcendentals=0, bytes_accessed=bytes_accessed),
    )(x_flat, masks, w2, bc, wl, bl)

    return out_padded[:, :, :NC]


if __name__ == "__main__":
    key = jax.random.PRNGKey(0)
    k_x, k_wc, k_bc, k_wl, k_bl = jax.random.split(key, 5)

    batch = 2
    input_sequence_length = 8     # conv in-channels
    output_sequence_length = 8    # conv out-channels
    embedding_dim = 16            # spatial H = W
    kernel_size = 3
    num_classes = 32              # config.data.num_tokens

    H = W = embedding_dim
    x = jax.random.normal(
        k_x, (batch, input_sequence_length, H, W), jnp.float32)
    conv_w = 0.1 * jax.random.normal(
        k_wc, (output_sequence_length, input_sequence_length, kernel_size, kernel_size),
        jnp.float32)
    conv_b = 0.1 * jax.random.normal(k_bc, (output_sequence_length,), jnp.float32)
    lin_w = 0.1 * jax.random.normal(k_wl, (num_classes, H * W), jnp.float32)
    lin_b = 0.1 * jax.random.normal(k_bl, (num_classes,), jnp.float32)

    out = conv_classifier_forward(x, conv_w, conv_b, lin_w, lin_b)
    jax.block_until_ready(out)

    # Pure-JAX f32 reference matching the PyTorch module exactly.
    ref_conv = lax.conv_general_dilated(
        x, conv_w, window_strides=(1, 1), padding="SAME",
        dimension_numbers=("NCHW", "OIHW", "NCHW"),
        precision=lax.Precision.HIGHEST)
    ref_conv = ref_conv + conv_b.reshape(1, -1, 1, 1)
    ref_flat = ref_conv.reshape(batch, output_sequence_length, H * W)
    ref_out = jnp.einsum("bcf,nf->bcn", ref_flat, lin_w,
                         precision=lax.Precision.HIGHEST) + lin_b

    assert out.shape == (batch, output_sequence_length, num_classes), out.shape
    max_err = float(jnp.max(jnp.abs(out - ref_out)))
    # Kernel uses bf16 matmul operands with f32 accumulation vs f32 reference.
    assert jnp.allclose(out, ref_out, atol=3e-2, rtol=3e-2), f"max_err={max_err}"

    print("KERNEL_OK")
</pallas_src>

<mosaic_0001>
module attributes {stable_mosaic.version = 11 : i64} {
  func.func @_conv_classifier_kernel(%arg0: i32, %arg1: memref<1x8x256xf32, #tpu.memory_space<vmem>>, %arg2: memref<9x256xf32, #tpu.memory_space<vmem>>, %arg3: memref<8x72xbf16, #tpu.memory_space<vmem>>, %arg4: memref<8x1xf32, #tpu.memory_space<vmem>>, %arg5: memref<256x128xbf16, #tpu.memory_space<vmem>>, %arg6: memref<1x128xf32, #tpu.memory_space<vmem>>, %arg7: memref<1x8x128xf32, #tpu.memory_space<vmem>>) attributes {dimension_semantics = [#tpu.dimension_semantics<parallel>], iteration_bounds = array<i64: 2>, scalar_prefetch = 0 : i64, scratch_operands = 0 : i64, tpu.core_type = #tpu.core_type<tc>, window_params = [{transform_indices = @transform_0, window_bounds = array<i64: 1, 8, 256>}, {pipeline_mode = #tpu.pipeline_mode<synchronous>, transform_indices = @transform_1, window_bounds = array<i64: 9, 256>}, {pipeline_mode = #tpu.pipeline_mode<synchronous>, transform_indices = @transform_2, window_bounds = array<i64: 8, 72>}, {pipeline_mode = #tpu.pipeline_mode<synchronous>, transform_indices = @transform_3, window_bounds = array<i64: 8, 1>}, {pipeline_mode = #tpu.pipeline_mode<synchronous>, transform_indices = @transform_4, window_bounds = array<i64: 256, 128>}, {pipeline_mode = #tpu.pipeline_mode<synchronous>, transform_indices = @transform_5, window_bounds = array<i64: 1, 128>}, {transform_indices = @transform_6, window_bounds = array<i64: 1, 8, 128>}]} {
    %c0 = arith.constant 0 : index
    %c0_0 = arith.constant 0 : index
    %c0_1 = arith.constant 0 : index
    %0 = vector.load %arg1[%c0, %c0_0, %c0_1] : memref<1x8x256xf32, #tpu.memory_space<vmem>>, vector<1x8x256xf32>
    %1 = vector.shape_cast %0 : vector<1x8x256xf32> to vector<8x256xf32>
    %c17_i32 = arith.constant 17 : i32
    %2 = tpu.dynamic_rotate %1 by %c17_i32 dim 1 : vector<8x256xf32>, i32 -> vector<8x256xf32>
    %c0_2 = arith.constant 0 : index
    %c0_3 = arith.constant 0 : index
    %3 = vector.load %arg2[%c0_2, %c0_3] : memref<9x256xf32, #tpu.memory_space<vmem>>, vector<1x256xf32>
    %4 = vector.broadcast %3 : vector<1x256xf32> to vector<8x256xf32>
    %5 = arith.mulf %2, %4 : vector<8x256xf32>
    %c16_i32 = arith.constant 16 : i32
    %6 = tpu.dynamic_rotate %1 by %c16_i32 dim 1 : vector<8x256xf32>, i32 -> vector<8x256xf32>
    %c1 = arith.constant 1 : index
    %c0_4 = arith.constant 0 : index
    %7 = vector.load %arg2[%c1, %c0_4] : memref<9x256xf32, #tpu.memory_space<vmem>>, vector<1x256xf32>
    %8 = vector.broadcast %7 : vector<1x256xf32> to vector<8x256xf32>
    %9 = arith.mulf %6, %8 : vector<8x256xf32>
    %c15_i32 = arith.constant 15 : i32
    %10 = tpu.dynamic_rotate %1 by %c15_i32 dim 1 : vector<8x256xf32>, i32 -> vector<8x256xf32>
    %c2 = arith.constant 2 : index
    %c0_5 = arith.constant 0 : index
    %11 = vector.load %arg2[%c2, %c0_5] : memref<9x256xf32, #tpu.memory_space<vmem>>, vector<1x256xf32>
    %12 = vector.broadcast %11 : vector<1x256xf32> to vector<8x256xf32>
    %13 = arith.mulf %10, %12 : vector<8x256xf32>
    %c1_i32 = arith.constant 1 : i32
    %14 = tpu.dynamic_rotate %1 by %c1_i32 dim 1 : vector<8x256xf32>, i32 -> vector<8x256xf32>
    %c3 = arith.constant 3 : index
    %c0_6 = arith.constant 0 : index
    %15 = vector.load %arg2[%c3, %c0_6] : memref<9x256xf32, #tpu.memory_space<vmem>>, vector<1x256xf32>
    %16 = vector.broadcast %15 : vector<1x256xf32> to vector<8x256xf32>
    %17 = arith.mulf %14, %16 : vector<8x256xf32>
    %c255_i32 = arith.constant 255 : i32
    %18 = tpu.dynamic_rotate %1 by %c255_i32 dim 1 : vector<8x256xf32>, i32 -> vector<8x256xf32>
    %c5 = arith.constant 5 : index
    %c0_7 = arith.constant 0 : index
    %19 = vector.load %arg2[%c5, %c0_7] : memref<9x256xf32, #tpu.memory_space<vmem>>, vector<1x256xf32>
    %20 = vector.broadcast %19 : vector<1x256xf32> to vector<8x256xf32>
    %21 = arith.mulf %18, %20 : vector<8x256xf32>
    %c241_i32 = arith.constant 241 : i32
    %22 = tpu.dynamic_rotate %1 by %c241_i32 dim 1 : vector<8x256xf32>, i32 -> vector<8x256xf32>
    %c6 = arith.constant 6 : index
    %c0_8 = arith.constant 0 : index
    %23 = vector.load %arg2[%c6, %c0_8] : memref<9x256xf32, #tpu.memory_space<vmem>>, vector<1x256xf32>
    %24 = vector.broadcast %23 : vector<1x256xf32> to vector<8x256xf32>
    %25 = arith.mulf %22, %24 : vector<8x256xf32>
    %c240_i32 = arith.constant 240 : i32
    %26 = tpu.dynamic_rotate %1 by %c240_i32 dim 1 : vector<8x256xf32>, i32 -> vector<8x256xf32>
    %c7 = arith.constant 7 : index
    %c0_9 = arith.constant 0 : index
    %27 = vector.load %arg2[%c7, %c0_9] : memref<9x256xf32, #tpu.memory_space<vmem>>, vector<1x256xf32>
    %28 = vector.broadcast %27 : vector<1x256xf32> to vector<8x256xf32>
    %29 = arith.mulf %26, %28 : vector<8x256xf32>
    %c239_i32 = arith.constant 239 : i32
    %30 = tpu.dynamic_rotate %1 by %c239_i32 dim 1 : vector<8x256xf32>, i32 -> vector<8x256xf32>
    %c8 = arith.constant 8 : index
    %c0_10 = arith.constant 0 : index
    %31 = vector.load %arg2[%c8, %c0_10] : memref<9x256xf32, #tpu.memory_space<vmem>>, vector<1x256xf32>
    %32 = vector.broadcast %31 : vector<1x256xf32> to vector<8x256xf32>
    %33 = arith.mulf %30, %32 : vector<8x256xf32>
    %34 = tpu.concatenate %5, %9, %13, %17, %1, %21, %25, %29, %33 in 0 : vector<8x256xf32>, vector<8x256xf32>, vector<8x256xf32>, vector<8x256xf32>, vector<8x256xf32>, vector<8x256xf32>, vector<8x256xf32>, vector<8x256xf32>, vector<8x256xf32> -> vector<72x256xf32>
    %c0_11 = arith.constant 0 : index
    %c0_12 = arith.constant 0 : index
    %35 = vector.load %arg3[%c0_11, %c0_12] : memref<8x72xbf16, #tpu.memory_space<vmem>>, vector<8x72xbf16>
    %36 = arith.truncf %34 : vector<72x256xf32> to vector<72x256xbf16>
    %cst = arith.constant dense<0.000000e+00> : vector<8x256xf32>
    %37 = tpu.matmul %35, %36, %cst {dimension_numbers = #tpu.dot_dimension_numbers<[1], [0], [0], [1], [0, 0, 1, 1], [], []>} : vector<8x72xbf16>, vector<72x256xbf16>, vector<8x256xf32> -> vector<8x256xf32>
    %c0_13 = arith.constant 0 : index
    %c0_14 = arith.constant 0 : index
    %38 = vector.load %arg4[%c0_13, %c0_14] : memref<8x1xf32, #tpu.memory_space<vmem>>, vector<8x1xf32>
    %39 = vector.broadcast %38 : vector<8x1xf32> to vector<8x256xf32>
    %40 = arith.addf %37, %39 : vector<8x256xf32>
    %41 = arith.truncf %40 : vector<8x256xf32> to vector<8x256xbf16>
    %c0_15 = arith.constant 0 : index
    %c0_16 = arith.constant 0 : index
    %42 = vector.load %arg5[%c0_15, %c0_16] : memref<256x128xbf16, #tpu.memory_space<vmem>>, vector<256x128xbf16>
    %cst_17 = arith.constant dense<0.000000e+00> : vector<8x128xf32>
    %43 = tpu.matmul %41, %42, %cst_17 {dimension_numbers = #tpu.dot_dimension_numbers<[1], [0], [0], [1], [0, 0, 1, 1], [], []>} : vector<8x256xbf16>, vector<256x128xbf16>, vector<8x128xf32> -> vector<8x128xf32>
    %c0_18 = arith.constant 0 : index
    %c0_19 = arith.constant 0 : index
    %44 = vector.load %arg6[%c0_18, %c0_19] : memref<1x128xf32, #tpu.memory_space<vmem>>, vector<1x128xf32>
    %45 = vector.broadcast %44 : vector<1x128xf32> to vector<8x128xf32>
    %46 = arith.addf %43, %45 : vector<8x128xf32>
    %c0_20 = arith.constant 0 : index
    %c0_21 = arith.constant 0 : index
    %c0_22 = arith.constant 0 : index
    %47 = vector.load %arg7[%c0_20, %c0_21, %c0_22] : memref<1x8x128xf32, #tpu.memory_space<vmem>>, vector<1x8x128xf32>
    %48 = vector.shape_cast %47 : vector<1x8x128xf32> to vector<8x128xf32>
    %49 = vector.shape_cast %46 : vector<8x128xf32> to vector<1x8x128xf32>
    tpu.vector_store %arg7[%c0_20, %c0_21, %c0_22], %49 {strides = array<i32>} : memref<1x8x128xf32, #tpu.memory_space<vmem>>, vector<1x8x128xf32>,
    return
  }
  func.func @transform_0(%arg0: i32) -> (i32, i32, i32) {
    %c0_i32 = arith.constant 0 : i32
    %c0_i32_0 = arith.constant 0 : i32
    %c0_i32_1 = arith.constant 0 : i32
    return %arg0, %c0_i32, %c0_i32_0 : i32, i32, i32
  }
  func.func @transform_1(%arg0: i32) -> (i32, i32) {
    %c0_i32 = arith.constant 0 : i32
    %c0_i32_0 = arith.constant 0 : i32
    %c0_i32_1 = arith.constant 0 : i32
    return %c0_i32, %c0_i32_0 : i32, i32
  }
  func.func @transform_2(%arg0: i32) -> (i32, i32) {
    %c0_i32 = arith.constant 0 : i32
    %c0_i32_0 = arith.constant 0 : i32
    %c0_i32_1 = arith.constant 0 : i32
    return %c0_i32, %c0_i32_0 : i32, i32
  }
  func.func @transform_3(%arg0: i32) -> (i32, i32) {
    %c0_i32 = arith.constant 0 : i32
    %c0_i32_0 = arith.constant 0 : i32
    %c0_i32_1 = arith.constant 0 : i32
    return %c0_i32, %c0_i32_0 : i32, i32
  }
  func.func @transform_4(%arg0: i32) -> (i32, i32) {
    %c0_i32 = arith.constant 0 : i32
    %c0_i32_0 = arith.constant 0 : i32
    %c0_i32_1 = arith.constant 0 : i32
    return %c0_i32, %c0_i32_0 : i32, i32
  }
  func.func @transform_5(%arg0: i32) -> (i32, i32) {
    %c0_i32 = arith.constant 0 : i32
    %c0_i32_0 = arith.constant 0 : i32
    %c0_i32_1 = arith.constant 0 : i32
    return %c0_i32, %c0_i32_0 : i32, i32
  }
  func.func @transform_6(%arg0: i32) -> (i32, i32, i32) {
    %c0_i32 = arith.constant 0 : i32
    %c0_i32_0 = arith.constant 0 : i32
    %c0_i32_1 = arith.constant 0 : i32
    return %arg0, %c0_i32, %c0_i32_0 : i32, i32, i32
  }
}

</mosaic_0001>

<bundles_post_ra>
// kernel: conv_classifier_forward.1
= control target key start
LH: loop header
LB: loop body
LE: loop exit
PB: predicated region body
PF: predicated region fallthrough
CT: control target
= control target key end

     0   :  { %11 = vsyncpa [#allocation3], 0  ;;  %s1217_s0 = inlined_call_operand.vmem [shape: f32[2,8,256], index: 0, kind: input, shape index: {}]   ;;  %s1218_s1 = inlined_call_operand.vmem [shape: f32[9,256], index: 1, kind: input, shape index: {}]   ;;  %s1219_s2 = inlined_call_operand.vmem [shape: bf16[8,72], index: 2, kind: input, shape index: {}]   ;;  %s1220_s3 = inlined_call_operand.vmem [shape: f32[8,1], index: 3, kind: input, shape index: {}]   ;;  %s1221_s4 = inlined_call_operand.vmem [shape: bf16[256,128], index: 4, kind: input, shape index: {}]   ;;  %s1222_s5 = inlined_call_operand.vmem [shape: f32[1,128], index: 5, kind: input, shape index: {}]   ;;  %s1223_s6 = inlined_call_operand.hbm [shape: f32[2,8,128], index: 6, kind: output, shape index: {}]  }
   0x1   :  { %13 = vsyncpa [#allocation3 + $0x1], 0  ;;  %s984_s21 = smov 0   ;;  %s986_s22 = smov 0  }
   0x2   :  { %s988_s23 = smov 0   ;;  %s990_s24 = smov 0  }
   0x3 LB: > { %s1005_s25 = sadd.s32 4294967295, %s937_s24   ;;  %s750_s26 = sadd.s32 4294967294, %s937_s24   ;;  %s937_s24 = sphi %s990_s24, %s1229_s24   ;;  %s933_s23 = sphi %s988_s23, %s1228_s23   ;;  %s929_s22 = sphi %s986_s22, %s1227_s22   ;;  %s925_s21 = sphi %s984_s21, %s1226_s21  }
   0x4   : > { %s1009_s27 = sadd.s32 1, %s937_s24   ;;  %s157_s28 = sadd.s32 1, %s933_s23 }
   0x5   : > { %s154_s29 = ssub.s32 %s937_s24, %s1009_s27  ;;  %p167_p0 = scmp.ne.s32.totalorder %s933_s23, %s929_s22 }
   0x6   : > { %p155_p1 = scmp.eq.s32.totalorder %s154_s29, 0  ;;  %p168_p2 = scmp.eq.s32.totalorder %s1005_s25, 1 }
   0x7   : > { %p173_p3 = scmp.ne.s32.totalorder %s929_s22, %s925_s21  ;;  %p174_p4 = scmp.eq.s32.totalorder %s750_s26, 1 }
   0x8   : > { %s1020_s30 = scalar_select %p155_p1, %s933_s23, %s157_s28  }
   0x9   : > { %p1022_p5 = por %p168_p2, %p167_p0  ;;  %p1026_p6 = por %p174_p4, %p173_p3 }
   0xa   : > { %p753_p7 = scmp.ge.s32.totalorder %s937_s24, 1  ;;  %p215_p8 = scmp.lt.s32.totalorder %s937_s24, 3 }
   0xc   : > { %p216_p9 = pnand %p753_p7, %p215_p8 }
   0xd   : > { %p245_p10 = scmp.lt.s32.totalorder (!%p216_p9), %s1005_s25, 1  ;;  %s939_s14 = smov (!%p216_p9), 16   ;;  %v945_v2 = vmov (!%p216_p9), 0   ;;  %v859_v3 = vld [vmem:[%s1221_s4 + $0x40] sm:$0xff] (!%p216_p9)   ;;  %v861_v5 = vld [vmem:[%s1221_s4 + $0x48] sm:$0xff] (!%p216_p9)   ;;  %v863_v7 = vld [vmem:[%s1221_s4 + $0x50] sm:$0xff] (!%p216_p9)   ;;  %v257_v17 = vlaneseq (!%p216_p9) }
   0xe   : > { %219 = sbr.rel (%p216_p9) target bundleno = 627 (0x273), region = 44  ;;  %s940_s15 = smov (!%p216_p9), 17   ;;  %490 = vmatprep.mubr.bf16.mxu0 (!%p216_p9), %v945_v2  ;;  %858 = vset.pattern.permute.xlu0 (!%p216_p9), %v945_v2  ;;  %v860_v4 = vld [vmem:[%s1221_s4] sm:$0xff] (!%p216_p9)   ;;  %v862_v6 = vld [vmem:[%s1221_s4 + $0x8] sm:$0xff] (!%p216_p9)   ;;  %v864_v9 = vld [vmem:[%s1221_s4 + $0x10] sm:$0xff] (!%p216_p9)   ;;  %vm451_vm8 = vcmask (!%p216_p9), 1043456  }
   0xf   : > { %s941_s16 = smov (!%p216_p9), 15   ;;  %s942_s17 = smov (!%p216_p9), 1   ;;  %788 = vmatprep.subr.bf16.mxu1 (!%p216_p9), %v859_v3  ;;  %v441_v8 = vld [vmem:[%s1220_s3] sm:$0xff] (!%p216_p9)  ;;  %v865_v10 = vld [vmem:[%s1221_s4 + $0x58] sm:$0xff] (!%p216_p9)   ;;  %v869_v14 = vld [vmem:[%s1221_s4 + $0x68] sm:$0xff] (!%p216_p9)   ;;  %v265_v18 = vshrl.u32 (!%p216_p9), %v257_v17, 7 }
  0x10   : > { %s943_s18 = smov (!%p216_p9), 127   ;;  %s944_s19 = smov (!%p216_p9), 113   ;;  %789 = vmatpush3.bf16.msra.mxu1 (!%p216_p9), %v860_v4  ;;  %v866_v11 = vld [vmem:[%s1221_s4 + $0x18] sm:$0xff] (!%p216_p9)   ;;  %v867_v12 = vld [vmem:[%s1221_s4 + $0x60] sm:$0xff] (!%p216_p9)   ;;  %v870_v15 = vld [vmem:[%s1221_s4 + $0x28] sm:$0xff] (!%p216_p9)   ;;  %v1099_v19 = vand.u32 (!%p216_p9), 127, %v257_v17 }
  0x11   : > { %s946_s20 = smov (!%p216_p9), 112   ;;  %790 = vmatprep.subr.bf16.mxu1 (!%p216_p9), %v861_v5  ;;  %v868_v13 = vld [vmem:[%s1221_s4 + $0x20] sm:$0xff] (!%p216_p9)   ;;  %v871_v16 = vld [vmem:[%s1221_s4 + $0x70] sm:$0xff] (!%p216_p9)   ;;  %v1101_v20 = vsub.s32 (!%p216_p9), 0, %v265_v18  ;;  %v1103_v21 = vsub.s32 (!%p216_p9), 1, %v265_v18  ;;  %vm447_vm9 = vcmask (!%p216_p9), 588800  }
  0x12   : > { %v757_v22 = vld [vmem:[%s1218_s1 + $0x1] ss:$8 sm:$0x3] (!%p216_p9)  ;;  %v262_v23 = vld [vmem:[%s1218_s1] ss:$8 sm:$0x3] (!%p216_p9) }
  0x13   : > { %vm280_vm0 = vcmp.lt.s32.totalorder (!%p216_p9), %v1099_v19, 16  ;;  %vm259_vm1 = vcmp.lt.s32.totalorder (!%p216_p9), %v1099_v19, 17  ;;  %v289_v26 = vrot.slane (!%p216_p9), %v757_v22, %v1101_v20  ;;  %v267_v27 = vrot.slane (!%p216_p9), %v262_v23, %v1101_v20  ;;  %v758_v40 = vld [vmem:[%s1218_s1 + $0x2] ss:$8 sm:$0x3] (!%p216_p9) }
  0x14   : > { %791 = vmatpush3.bf16.msra.mxu1 (!%p216_p9), %v862_v6  ;;  %v271_v28 = vrot.slane (!%p216_p9), %v262_v23, %v1103_v21  ;;  %v293_v29 = vrot.slane (!%p216_p9), %v757_v22, %v1103_v21  ;;  %v759_v41 = vld [vmem:[%s1218_s1 + $0x3] ss:$8 sm:$0x3] (!%p216_p9)  ;;  %vm302_vm2 = vcmp.lt.s32.totalorder (!%p216_p9), %v1099_v19, 15  ;;  %vm324_vm3 = vcmp.lt.s32.totalorder (!%p216_p9), %v1099_v19, 1 }
  0x15   : > { %s246_s9 = scalar_select %p245_p10, %s1005_s25, 1  ;;  %792 = vmatprep.subr.bf16.mxu1 %v863_v7  ;;  %v311_v46 = vrot.slane %v758_v40, %v1101_v20  ;;  %v315_v47 = vrot.slane %v758_v40, %v1103_v21  ;;  %v333_v48 = vrot.slane %v759_v41, %v1101_v20  ;;  %v337_v49 = vrot.slane %v759_v41, %v1103_v21  ;;  %v760_v50 = vld [vmem:[%s1218_s1 + $0x5] ss:$8 sm:$0x3] }
  0x16   : > { %vm346_vm4 = vcmp.lt.s32.totalorder %v1099_v19, 127  ;;  %v355_v57 = vrot.slane %v760_v50, %v1101_v20  ;;  %v359_v58 = vrot.slane %v760_v50, %v1103_v21  ;;  %vm368_vm5 = vcmp.lt.s32.totalorder %v1099_v19, 113  ;;  %v763_v22 = vld [vmem:[%s1218_s1 + $0x10] ss:$8 sm:$0x3] }
  0x17   : > { %s787_s10 = sshll.u32 %s246_s9, 4  ;;  %vm390_vm6 = vcmp.lt.s32.totalorder %v1099_v19, 112  ;;  %vm412_vm7 = vcmp.lt.s32.totalorder %v1099_v19, 111 }
  0x18   : > { %s249_s13 = scalar_lea.vmem %s1217_s0, %s787_s10  ;;  %793 = vmatpush3.bf16.msra.mxu1 %v864_v9  ;;  %v761_v9 = vld [vmem:[%s1218_s1 + $0x6] ss:$8 sm:$0x3] }
  0x19   : > { %v1037_v0 = vld [vmem:[%s249_s13] sm:$0xff]  ;;  %v1041_v1 = vld [vmem:[%s249_s13 + $0x8] sm:$0xff]  ;;  %794 = vmatprep.subr.bf16.mxu1 %v865_v10 }
  0x1a   : > { %276 = vrot.lane.b32.xlu1 %v1037_v0, %s939_s14  ;;  %253 = vrot.lane.b32.xlu0 %v1037_v0, %s940_s15  ;;  %v762_v10 = vld [vmem:[%s1218_s1 + $0x7] ss:$8 sm:$0x3] }
  0x1b   : > { %v399_v17 = vrot.slane %v762_v10, %v1101_v20  ;;  %v403_v18 = vrot.slane %v762_v10, %v1103_v21 }
  0x1c   : > { %795 = vmatpush3.bf16.msra.mxu1 %v866_v11 }
  0x1d   : > { %796 = vmatprep.subr.bf16.mxu1 %v867_v12 }
  0x1e   : > { %278 = vrot.lane.b32.xlu1 %v1041_v1, %s939_s14  ;;  %255 = vrot.lane.b32.xlu0 %v1041_v1, %s940_s15  ;;  %s947_s14 = smov 111  }
  0x20   : > { %797 = vmatpush3.bf16.msra.mxu1 %v868_v13 }
  0x21   : > { %798 = vmatprep.subr.bf16.mxu1 %v869_v14 }
  0x22   : > { %300 = vrot.lane.b32.xlu1 %v1041_v1, %s941_s16  ;;  %298 = vrot.lane.b32.xlu0 %v1037_v0, %s941_s16 }
  0x24   : > { %799 = vmatpush3.bf16.msra.mxu1 %v870_v15  ;;  %v377_v15 = vrot.slane %v761_v9, %v1101_v20 }
  0x25   : > { %800 = vmatprep.subr.bf16.mxu1 %v871_v16  ;;  %v381_v16 = vrot.slane %v761_v9, %v1103_v21 }
  0x26   : > { %322 = vrot.lane.b32.xlu1 %v1041_v1, %s942_s17  ;;  %320 = vrot.lane.b32.xlu0 %v1037_v0, %s942_s17 }
  0x2a   : > { %344 = vrot.lane.b32.xlu1 %v1041_v1, %s943_s18  ;;  %342 = vrot.lane.b32.xlu0 %v1037_v0, %s943_s18  ;;  %s784_s18 = sshll.u32 %s1005_s25, 7  ;;  %s948_s25 = smov [#allocation2]  }
  0x2b   : > { %s1175_s29 = scalar_lea.hbm %s1223_s6, %s784_s18  ;;  %s879_s11 = sshll.u32 %s948_s25, 4  ;;  %s880_s11 = int_to_ptr.vmem [resolvable:$false] %s879_s11 }
  0x2c   : > { %s881_s12 = scalar_lea.vmem %s880_s11, 256 }
  0x2e   : > { %366 = vrot.lane.b32.xlu1 %v1041_v1, %s944_s19  ;;  %364 = vrot.lane.b32.xlu0 %v1037_v0, %s944_s19 }
  0x32   : > { %388 = vrot.lane.b32.xlu1 %v1041_v1, %s946_s20  ;;  %386 = vrot.lane.b32.xlu0 %v1037_v0, %s946_s20 }
  0x36   : > { %410 = vrot.lane.b32.xlu1 %v1041_v1, %s947_s14  ;;  %408 = vrot.lane.b32.xlu0 %v1037_v0, %s947_s14  ;;  %s242_s14 = sand.u32 1, %s929_s22  }
  0x37   : > { %s754_s15 = sshll.u32 %s242_s14, 3  ;;  %s678_s9 = scalar_lea.sflag [#allocation3], %s242_s14 }
  0x38   : > { %s244_s19 = scalar_lea.vmem [#allocation2], %s754_s15 }
  0x39   : > { %s691_s20 = sshll.u32 %s244_s19, 4  ;;  %s1177_s20 = int_to_ptr.vmem [resolvable:$true] %s691_s20 }
  0x3a   : > { %444 = vperm.xlu0 %858, %v441_v8   ;;  %s875_s10 = scalar_lea.vmem %s1177_s20, 128  ;;  %p882_p0 = scmp.lt.s32.totalorder %s1177_s20, %s880_s11 }
  0x3b   : > { %p876_p11 = scmp.ne.s32.totalorder %s1177_s20, %s875_s10  ;;  %p883_p1 = scmp.lt.s32.totalorder %s881_s12, %s875_s10 }
  0x3d   : > { %p877_p12 = pnand %p876_p11, %p1022_p5  ;;  %p884_p2 = por %p883_p1, %p882_p0 }
  0x3f   : > { %p878_p13 = pneg %p877_p12 }
  0x41   : > { %p885_p3 = pnand %p884_p2, %p878_p13 }
  0x8c   : > { %v277_v24 = vpop.permute.xlu1 %276  ;;  %v254_v25 = vpop.permute.xlu0 %253 }
  0x90   : > { %v279_v30 = vpop.permute.xlu1 %278  ;;  %v256_v31 = vpop.permute.xlu0 %255 }
  0x91   : > { %v281_v32 = vsel %vm280_vm0, %v277_v24, %v279_v30  ;;  %v282_v33 = vsel %vm280_vm0, %v279_v30, %v277_v24  ;;  %v260_v34 = vsel %vm259_vm1, %v254_v25, %v256_v31  ;;  %v261_v35 = vsel %vm259_vm1, %v256_v31, %v254_v25 }
  0x92   : > { %v296_v36 = vmul.f32 %v289_v26, %v282_v33  ;;  %v274_v37 = vmul.f32 %v267_v27, %v261_v35  ;;  %v275_v38 = vmul.f32 %v271_v28, %v260_v34  ;;  %v297_v39 = vmul.f32 %v293_v29, %v281_v32 }
  0x93   : > { %v421_v27 = vrot.slane %v763_v22, %v1101_v20  ;;  %v425_v28 = vrot.slane %v763_v22, %v1103_v21  ;;  %v430_v21 = vld [vmem:[%s1219_s2] sm:$0xf] }
  0x94   : > { %v301_v42 = vpop.permute.xlu1 %300  ;;  %v299_v43 = vpop.permute.xlu0 %298  ;;  %v432_v44 = vpack.c.bf16 %v297_v39, %v275_v38  ;;  %v431_v45 = vpack.c.bf16 %v296_v36, %v274_v37 }
  0x95   : > { %v303_v51 = vsel %vm302_vm2, %v299_v43, %v301_v42  ;;  %v304_v52 = vsel %vm302_vm2, %v301_v42, %v299_v43  ;;  %v872_v42 = vld [vmem:[%s1221_s4 + $0x30] sm:$0xff]   ;;  %v873_v43 = vld [vmem:[%s1221_s4 + $0x78] sm:$0xff]  }
  0x96   : > { %458 = vmatprep.subr.bf16.mxu0 %v432_v44  ;;  %v318_v59 = vmul.f32 %v311_v46, %v304_v52  ;;  %v319_v60 = vmul.f32 %v315_v47, %v303_v51  ;;  %801 = vmatpush3.bf16.msra.mxu1 %v872_v42  ;;  %v874_v44 = vld [vmem:[%s1221_s4 + $0x38] sm:$0xff]  }
  0x97   : > { %459 = vmatpush1.bf16.msra.mxu0 %v431_v45  ;;  %802 = vmatprep.subr.bf16.mxu1 %v873_v43 }
  0x98   : > { %v323_v53 = vpop.permute.xlu1 %322  ;;  %v321_v54 = vpop.permute.xlu0 %320 }
  0x99   : > { %v325_v55 = vsel %vm324_vm3, %v321_v54, %v323_v53  ;;  %v326_v56 = vsel %vm324_vm3, %v323_v53, %v321_v54 }
  0x9a   : > { %v340_v61 = vmul.f32 %v333_v48, %v326_v56  ;;  %v341_v62 = vmul.f32 %v337_v49, %v325_v55  ;;  %803 = vmatpush3.bf16.msra.mxu1 %v874_v44  ;;  %v766_v55 = vld [vmem:[%s1222_s5] ss:$0 sm:$0xff] }
  0x9c   : > { %v345_v63 = vpop.permute.xlu1 %344  ;;  %v343_v2 = vpop.permute.xlu0 %342  ;;  %v434_v3 = vpack.c.bf16 %v341_v62, %v319_v60  ;;  %v433_v4 = vpack.c.bf16 %v340_v61, %v318_v59 }
  0x9d   : > { %v347_v5 = vsel %vm346_vm4, %v343_v2, %v345_v63  ;;  %v348_v6 = vsel %vm346_vm4, %v345_v63, %v343_v2 }
  0x9e   : > { %v362_v7 = vmul.f32 %v355_v57, %v347_v5  ;;  %v363_v8 = vmul.f32 %v359_v58, %v348_v6  ;;  %460 = vmatprep.subr.bf16.mxu0 %v434_v3 }
  0x9f   : > { %461 = vmatpush1.bf16.msra.mxu0 %v433_v4 }
  0xa0   : > { %v367_v11 = vpop.permute.xlu1 %366  ;;  %v365_v12 = vpop.permute.xlu0 %364  ;;  %v436_v13 = vpack.c.bf16 %v363_v8, %v1041_v1  ;;  %v435_v14 = vpack.c.bf16 %v362_v7, %v1037_v0 }
  0xa1   : > { %v369_v23 = vsel %vm368_vm5, %v365_v12, %v367_v11  ;;  %v370_v24 = vsel %vm368_vm5, %v367_v11, %v365_v12 }
  0xa2   : > { %462 = vmatprep.subr.bf16.mxu0 %v436_v13  ;;  %v384_v29 = vmul.f32 %v377_v15, %v369_v23  ;;  %v385_v30 = vmul.f32 %v381_v16, %v370_v24 }
  0xa3   : > { %463 = vmatpush1.bf16.msra.mxu0 %v435_v14 }
  0xa4   : > { %v389_v1 = vpop.permute.xlu1 %388  ;;  %v387_v0 = vpop.permute.xlu0 %386 }
  0xa5   : > { %v391_v25 = vsel %vm390_vm6, %v387_v0, %v389_v1  ;;  %v392_v26 = vsel %vm390_vm6, %v389_v1, %v387_v0 }
  0xa6   : > { %v406_v31 = vmul.f32 %v399_v17, %v391_v25  ;;  %v407_v32 = vmul.f32 %v403_v18, %v392_v26 }
  0xa8   : > { %v411_v33 = vpop.permute.xlu1 %410  ;;  %v409_v34 = vpop.permute.xlu0 %408  ;;  %v438_v35 = vpack.c.bf16 %v407_v32, %v385_v30  ;;  %v437_v36 = vpack.c.bf16 %v406_v31, %v384_v29 }
  0xa9   : > { %v413_v37 = vsel %vm412_vm7, %v409_v34, %v411_v33  ;;  %v414_v38 = vsel %vm412_vm7, %v411_v33, %v409_v34 }
  0xaa   : > { %v428_v39 = vmul.f32 %v421_v27, %v413_v37  ;;  %v429_v40 = vmul.f32 %v425_v28, %v414_v38  ;;  %464 = vmatprep.subr.bf16.mxu0 %v438_v35 }
  0xab   : > { %465 = vmatpush1.bf16.msra.mxu0 %v437_v36 }
  0xac   : > { %v439_v19 = vpack.c.bf16 %v428_v39, %v428_v39  ;;  %v440_v41 = vpack.c.bf16 %v429_v40, %v429_v40 }
  0xae   : > { %764 = vmatprep.subr.msk.bf16.mxu0 %vm451_vm8, %v440_v41  ;;  %v453_v20 = vsel %vm451_vm8, %v439_v19, 0 }
  0xaf   : > { %467 = vmatpush1.bf16.msra.mxu0 %v453_v20 }
  0xb2   : > { %765 = vmatmul.mubr.msk.bf16.vlgmr.msra.gmra.mrb[0].mxu0 %vm447_vm9, %v430_v21 }
  0xb9   : > { %v445_v45 = vpop.permute.xlu0 %444 }
 0x185   : > { %v492_v46 = vpop.f32.mrb[0].mxu0 }
 0x186   : > { %v493_v47 = vadd.f32 %v492_v46, %v445_v45  ;;  %v494_v48 = vpop.f32.mrb[1].mxu0 }
 0x187   : > { %v496_v49 = vpop.f32.mrb[2].mxu0  ;;  %v495_v50 = vadd.f32 %v494_v48, %v445_v45 }
 0x188   : > { %v497_v51 = vpop.f32.mrb[3].mxu0  ;;  %v499_v53 = vpack.c.bf16 %v493_v47, %v493_v47 }
 0x189   : > { %v500_v52 = vpack.c.bf16 %v495_v50, %v495_v50 }
 0x18b   : > { %668 = vmatprep.mubr.bf16.mxu1 %v500_v52 }
 0x18c   : > { %669 = vmatmul.mubr.bf16.vlgmr.msra.gmra.mrb[0].mxu1 %v499_v53 }
 0x25f   : > { %v804_v54 = vpop.f32.mrb[0].mxu1 }
 0x260   : > { %v805_v56 = vpop.f32.mrb[1].mxu1 }
 0x261   : > { %v806_v57 = vadd.f32 %v805_v56, %v804_v54  ;;  %v807_v58 = vpop.f32.mrb[2].mxu1 }
 0x262   : > { %v808_v59 = vpop.f32.mrb[3].mxu1 }
 0x263   : > { %v671_v60 = vadd.f32 %v806_v57, %v766_v55 }
 0x265   : > { %676 = vst [vmem:[%s244_s19] sm:$0xff] %v671_v60 }
 0x266   : > { %888 = shalt.err (!%p885_p3)
}
 0x267   : > { %s889_s13 = scalar_lea.hbm %s1175_s29, 128  ;;  %s893_s16 = scalar_lea.hbm %s1223_s6, 256 }
 0x268   : > { %p890_p4 = scmp.ne.s32.totalorder %s1175_s29, %s889_s13  ;;  %p894_p9 = scmp.lt.u32.totalorder %s1175_s29, %s1223_s6 }
 0x269   : > { %p895_p10 = scmp.lt.u32.totalorder %s893_s16, %s889_s13  ;;  %p897_p12 = scmp.lt.u32.totalorder %s889_s13, %s1175_s29 }
 0x26a   : > { %p891_p7 = pnand %p890_p4, %p1022_p5 }
 0x26b   : > { %p896_p11 = por %p895_p10, %p894_p9 }
 0x26c   : > { %p892_p8 = pneg %p891_p7 }
 0x26d   : > { %p898_p13 = por %p897_p12, %p896_p11 }
 0x26f   : > { %p899_p0 = pnand %p898_p13, %p892_p8 }
 0x271   : > { %902 = shalt.err (!%p899_p0)
}
 0x272   : > { %810 = dma.vmem_to_hbm [thread:$0]  (%p1022_p5), %s1177_s20, 128, %s1175_s29, %s678_s9  }
 0x273 PF: > { %p816_p1 = scmp.ge.s32.totalorder %s937_s24, 2  ;;  %s703_s19 = sand.u32 1, %s925_s21  }
 0x274   : > { %s704_s26 = scalar_lea.sflag [#allocation3], %s703_s19 }
 0x275   : > { %p813_p2 = pnand %p816_p1, %p1026_p6 }
 0x277   : > { %920 = dma.done.wait (!%p813_p2), %s704_s26, 128  }
 0x278   : > { %922 = vsyncadd (!%p813_p2), %s704_s26, 4294967168  ;;  %p16_p3 = scmp.ge.s32.totalorder %s1009_s27, 4   ;;  %s1226_s21 = smov %s929_s22 }
 0x279   : > { %s1227_s22 = smov %s933_s23  ;;  %s1228_s23 = smov %s1020_s30 }
 0x27a   : > { %s1229_s24 = smov %s1009_s27  ;;  %18 = sbr.rel (!%p16_p3) target bundleno = 3 (0x3), region = 86 }
 0x281   :  { %709 = vsyncpa [#allocation3], 1 }
 0x282   :  { %711 = vsyncpa [#allocation3 + $0x1], 1 }

</bundles_post_ra>
